<compile_context>
chip_gen: v5e
topology: v5e:2x2
jax: 0.10.0
libtpu: 0.0.40
codegen_flags: <defaults>
</compile_context>

<pallas_src>
import math

import jax
import jax.numpy as jnp
from jax import lax
from jax.experimental import pallas as pl
from jax.experimental.pallas import tpu as pltpu


def _round_up(x, m):
    return ((x + m - 1) // m) * m


def _pick_bb(B, block_b):
    """Batch tile size: sublane-full, and >=2 tiles when B allows (v7x megacore)."""
    bb = min(B, block_b)
    if pl.cdiv(B, bb) < 2 and B >= 16:
        bb = ((B + 1) // 2 + 7) // 8 * 8
    return bb


# ---------------------------------------------------------------------------
# Parameter packing: four nn.Linear(I+H, H) -> Wx (I,4Hp) bf16, Wh (Hp,4Hp) bf16,
# bias (1,4Hp) f32.  Column order [i | o | j | f]; j/f columns & biases scaled
# by 0.5 so sigmoid(z) = 0.5*tanh(z/2)+0.5 needs only ONE full-width tanh.
# Padding columns/rows are zero => padded carry lanes stay exactly zero.
# ---------------------------------------------------------------------------
def pack_params(w_i, w_j, w_f, w_o, b_i, b_j, b_f, b_o, input_size, H):
    Hp = _round_up(H, 128)

    def pad_cols(w):
        return w if w.shape[1] == Hp else jnp.pad(w, ((0, 0), (0, Hp - w.shape[1])))

    def pad_b(b):
        return b if b.shape[0] == Hp else jnp.pad(b, (0, Hp - b.shape[0]))

    def split(w):  # (I+H, H) -> x rows, state rows
        return w[:input_size], w[input_size:]

    wxi, whi = split(w_i)
    wxj, whj = split(w_j)
    wxf, whf = split(w_f)
    wxo, who = split(w_o)

    wx = jnp.concatenate(
        [pad_cols(wxi), pad_cols(wxo), pad_cols(0.5 * wxj), pad_cols(0.5 * wxf)], axis=1)
    wh = jnp.concatenate(
        [pad_cols(whi), pad_cols(who), pad_cols(0.5 * whj), pad_cols(0.5 * whf)], axis=1)
    wh = jnp.pad(wh, ((0, Hp - H), (0, 0)))                       # (Hp, 4Hp)
    bias = jnp.concatenate(
        [pad_b(b_i), pad_b(b_o), pad_b(0.5 * b_j), pad_b(0.5 * b_f)])[None, :]  # (1, 4Hp)

    return wx.astype(jnp.bfloat16), wh.astype(jnp.bfloat16), bias.astype(jnp.float32)


# ---------------------------------------------------------------------------
# Single-step cell kernel (the module's forward)
# ---------------------------------------------------------------------------
def _lstm_cell_kernel(x_ref, s_ref, c_ref, wx_ref, wh_ref, b_ref, sd_ref, cd_ref):
    Hp = c_ref.shape[-1]

    # Two bf16 MXU pushes (K=I and K=Hp), f32 accumulation; no concat needed.
    gates = (jnp.dot(x_ref[...], wx_ref[...], preferred_element_type=jnp.float32)
             + jnp.dot(s_ref[...].astype(jnp.bfloat16), wh_ref[...],
                       preferred_element_type=jnp.float32)
             + b_ref[...])

    # One full-width EUP tanh; sigmoid lanes are a contiguous half ([i|o|j|f]).
    th = jnp.tanh(gates)
    i = th[:, 0 * Hp:1 * Hp]
    o = th[:, 1 * Hp:2 * Hp]
    jf = 0.5 * th[:, 2 * Hp:] + 0.5          # sigmoid via pre-halved weights/bias
    j = jf[:, :Hp]
    f = jf[:, Hp:]

    celldot = c_ref[...] * f + i * j
    statedot = jnp.tanh(celldot) * o

    sd_ref[...] = statedot
    cd_ref[...] = celldot


def my_lstm_cell_concat(x, state, cell, wx, wh, bias, H, *, block_b=128):
    """One cell step. Returns (statedot, celldot), each (B, H)."""
    B, I = x.shape
    Hp = wh.shape[0]
    if H != Hp:
        state = jnp.pad(state, ((0, 0), (0, Hp - H)))
        cell = jnp.pad(cell, ((0, 0), (0, Hp - H)))

    x = x.astype(jnp.bfloat16)               # halves x DMA; matmul is bf16 anyway
    bb = _pick_bb(B, block_b)
    grid = (pl.cdiv(B, bb),)

    sd, cd = pl.pallas_call(
        _lstm_cell_kernel,
        out_shape=(jax.ShapeDtypeStruct((B, Hp), jnp.float32),
                   jax.ShapeDtypeStruct((B, Hp), jnp.float32)),
        grid=grid,
        in_specs=[
            pl.BlockSpec((bb, I), lambda b: (b, 0)),            # x (bf16, batch-tiled)
            pl.BlockSpec((bb, Hp), lambda b: (b, 0)),           # state
            pl.BlockSpec((bb, Hp), lambda b: (b, 0)),           # cell
            pl.BlockSpec((I, 4 * Hp), lambda b: (0, 0)),        # Wx (bf16, resident)
            pl.BlockSpec((Hp, 4 * Hp), lambda b: (0, 0)),       # Wh (bf16, resident)
            pl.BlockSpec((1, 4 * Hp), lambda b: (0, 0)),        # bias (resident)
        ],
        out_specs=(pl.BlockSpec((bb, Hp), lambda b: (b, 0)),
                   pl.BlockSpec((bb, Hp), lambda b: (b, 0))),
        compiler_params=pltpu.CompilerParams(
            dimension_semantics=("parallel",),                  # v7x: both TCs
            vmem_limit_bytes=48 * 1024 * 1024),
    )(x, state, cell, wx, wh, bias)

    if H != Hp:
        sd, cd = sd[:, :H], cd[:, :H]
    return sd, cd


# ---------------------------------------------------------------------------
# Sequence-fused kernel: T steps in ONE pallas_call.
# The x-projection is hoisted to the wrapper; only state @ Wh stays serial.
# NOTE: the time axis MUST be the innermost grid dim and marked "arbitrary"
# (the state/cell carry lives in VMEM scratch across time iterations).
# ---------------------------------------------------------------------------
def _lstm_seq_kernel(xproj_ref, s0_ref, c0_ref, wh_ref, sd_ref, cd_ref,
                     state_s, cell_s):
    t = pl.program_id(1)
    Hp = c0_ref.shape[-1]

    @pl.when(t == 0)
    def _():
        state_s[...] = s0_ref[...]
        cell_s[...] = c0_ref[...]

    # Serial-chain matmul is only K = Hp; x-projection arrives precomputed.
    gates = xproj_ref[0] + jnp.dot(state_s[...].astype(jnp.bfloat16), wh_ref[...],
                                   preferred_element_type=jnp.float32)

    th = jnp.tanh(gates)                      # one full-width tanh
    i = th[:, 0 * Hp:1 * Hp]
    o = th[:, 1 * Hp:2 * Hp]
    jf = 0.5 * th[:, 2 * Hp:] + 0.5
    j = jf[:, :Hp]
    f = jf[:, Hp:]

    celldot = cell_s[...] * f + i * j
    statedot = jnp.tanh(celldot) * o

    state_s[...] = statedot                   # VMEM-resident carry
    cell_s[...] = celldot
    sd_ref[0] = statedot                      # two lane-dense unmasked stores
    cd_ref[0] = celldot


def my_lstm_concat_sequence(x_seq, state0, cell0, wx, wh, bias, H, *, block_b=128):
    """Runs T cell steps inside one kernel. Returns (statedots, celldots), each (T, B, H)."""
    T, B, I = x_seq.shape
    Hp = wh.shape[0]

    # Hoisted input projection: one big T-parallel bf16 matmul at full MXU
    # utilization (bias folded in), outside the serial recurrence.
    xproj = (jnp.dot(x_seq.reshape(T * B, I).astype(jnp.bfloat16), wx,
                     preferred_element_type=jnp.float32)
             + bias).reshape(T, B, 4 * Hp)

    if H != Hp:
        state0 = jnp.pad(state0, ((0, 0), (0, Hp - H)))
        cell0 = jnp.pad(cell0, ((0, 0), (0, Hp - H)))

    bb = _pick_bb(B, block_b)
    grid = (pl.cdiv(B, bb), T)   # batch tiles parallel, time innermost/sequential

    sd, cd = pl.pallas_call(
        _lstm_seq_kernel,
        out_shape=(jax.ShapeDtypeStruct((T, B, Hp), jnp.float32),
                   jax.ShapeDtypeStruct((T, B, Hp), jnp.float32)),
        grid=grid,
        in_specs=[
            pl.BlockSpec((1, bb, 4 * Hp), lambda b, t: (t, b, 0)),   # xproj_t (pipelined)
            pl.BlockSpec((bb, Hp), lambda b, t: (b, 0)),             # state0
            pl.BlockSpec((bb, Hp), lambda b, t: (b, 0)),             # cell0
            pl.BlockSpec((Hp, 4 * Hp), lambda b, t: (0, 0)),         # Wh (bf16, resident)
        ],
        out_specs=(pl.BlockSpec((1, bb, Hp), lambda b, t: (t, b, 0)),
                   pl.BlockSpec((1, bb, Hp), lambda b, t: (t, b, 0))),
        scratch_shapes=[
            pltpu.VMEM((bb, Hp), jnp.float32),   # state carry
            pltpu.VMEM((bb, Hp), jnp.float32),   # cell carry
        ],
        compiler_params=pltpu.CompilerParams(
            dimension_semantics=("parallel", "arbitrary"),
            vmem_limit_bytes=48 * 1024 * 1024),
    )(xproj, state0, cell0, wh)

    if H != Hp:
        sd, cd = sd[..., :H], cd[..., :H]
    return sd, cd


# ---------------------------------------------------------------------------
# Pure-JAX f32 reference (faithful to the PyTorch module)
# ---------------------------------------------------------------------------
def _cell_reference(x, state, cell, params):
    w_i, w_j, w_f, w_o, b_i, b_j, b_f, b_o = params
    xs = jnp.concatenate([x, state], axis=-1)
    lin = lambda w, b: jnp.dot(xs, w, precision=lax.Precision.HIGHEST) + b
    i = jnp.tanh(lin(w_i, b_i))
    j = jax.nn.sigmoid(lin(w_j, b_j))
    f = jax.nn.sigmoid(lin(w_f, b_f))
    o = jnp.tanh(lin(w_o, b_o))
    celldot = cell * f + i * j
    statedot = jnp.tanh(celldot) * o
    return statedot, celldot


if __name__ == "__main__":
    B = 16           # batch (splits into 2 tiles -> both v7x TensorCores busy)
    I = 16           # input_size
    H = 32           # hidden_size (embedding_size); padded to 128 internally
    T = 8            # sequence length for the fused-rollout kernel
    dtype = jnp.float32

    key = jax.random.PRNGKey(0)
    keys = jax.random.split(key, 12)

    x = jax.random.normal(keys[0], (B, I), dtype)
    state = jax.random.normal(keys[1], (B, H), dtype)
    cell = jax.random.normal(keys[2], (B, H), dtype)
    x_seq = jax.random.normal(keys[3], (T, B, I), dtype)

    # Parameters mirror four nn.Linear(I+H, H) layers (JAX layout = torch W.T),
    # U(-1/sqrt(fan_in), +1/sqrt(fan_in)) init.
    fan_in = I + H
    bound = 1.0 / math.sqrt(fan_in)
    w_i = jax.random.uniform(keys[4], (fan_in, H), dtype, -bound, bound)
    w_j = jax.random.uniform(keys[5], (fan_in, H), dtype, -bound, bound)
    w_f = jax.random.uniform(keys[6], (fan_in, H), dtype, -bound, bound)
    w_o = jax.random.uniform(keys[7], (fan_in, H), dtype, -bound, bound)
    b_i = jax.random.uniform(keys[8], (H,), dtype, -bound, bound)
    b_j = jax.random.uniform(keys[9], (H,), dtype, -bound, bound)
    b_f = jax.random.uniform(keys[10], (H,), dtype, -bound, bound)
    b_o = jax.random.uniform(keys[11], (H,), dtype, -bound, bound)
    ref_params = (w_i, w_j, w_f, w_o, b_i, b_j, b_f, b_o)

    wx, wh, bias = pack_params(w_i, w_j, w_f, w_o, b_i, b_j, b_f, b_o, I, H)

    # --- single cell step (module forward) ---
    statedot, celldot = my_lstm_cell_concat(x, state, cell, wx, wh, bias, H)
    jax.block_until_ready((statedot, celldot))

    ref_statedot, ref_celldot = _cell_reference(x, state, cell, ref_params)
    # bf16 MXU inputs with f32 accumulation -> loosened tolerance vs. f32 ref.
    assert jnp.allclose(statedot, ref_statedot, atol=3e-2, rtol=3e-2)
    assert jnp.allclose(celldot, ref_celldot, atol=3e-2, rtol=3e-2)

    # --- fused T-step rollout (one pallas_call, carry VMEM-resident) ---
    sd_seq, cd_seq = my_lstm_concat_sequence(x_seq, state, cell, wx, wh, bias, H)
    jax.block_until_ready((sd_seq, cd_seq))

    s, c = state, cell
    ref_sds, ref_cds = [], []
    for t in range(T):
        s, c = _cell_reference(x_seq[t], s, c, ref_params)
        ref_sds.append(s)
        ref_cds.append(c)
    ref_sds = jnp.stack(ref_sds)
    ref_cds = jnp.stack(ref_cds)
    assert jnp.allclose(sd_seq, ref_sds, atol=5e-2, rtol=5e-2)
    assert jnp.allclose(cd_seq, ref_cds, atol=5e-2, rtol=5e-2)

    print("KERNEL_OK")
</pallas_src>

<mosaic_0001>
module attributes {stable_mosaic.version = 11 : i64} {
  func.func @_lstm_cell_kernel(%arg0: i32, %arg1: memref<8x16xbf16, #tpu.memory_space<vmem>>, %arg2: memref<8x128xf32, #tpu.memory_space<vmem>>, %arg3: memref<8x128xf32, #tpu.memory_space<vmem>>, %arg4: memref<16x512xbf16, #tpu.memory_space<vmem>>, %arg5: memref<128x512xbf16, #tpu.memory_space<vmem>>, %arg6: memref<1x512xf32, #tpu.memory_space<vmem>>, %arg7: memref<8x128xf32, #tpu.memory_space<vmem>>, %arg8: memref<8x128xf32, #tpu.memory_space<vmem>>) attributes {dimension_semantics = [#tpu.dimension_semantics<parallel>], iteration_bounds = array<i64: 2>, scalar_prefetch = 0 : i64, scratch_operands = 0 : i64, tpu.core_type = #tpu.core_type<tc>, window_params = [{transform_indices = @transform_0, window_bounds = array<i64: 8, 16>}, {transform_indices = @transform_1, window_bounds = array<i64: 8, 128>}, {transform_indices = @transform_2, window_bounds = array<i64: 8, 128>}, {pipeline_mode = #tpu.pipeline_mode<synchronous>, transform_indices = @transform_3, window_bounds = array<i64: 16, 512>}, {pipeline_mode = #tpu.pipeline_mode<synchronous>, transform_indices = @transform_4, window_bounds = array<i64: 128, 512>}, {pipeline_mode = #tpu.pipeline_mode<synchronous>, transform_indices = @transform_5, window_bounds = array<i64: 1, 512>}, {transform_indices = @transform_6, window_bounds = array<i64: 8, 128>}, {transform_indices = @transform_7, window_bounds = array<i64: 8, 128>}]} {
    %c0 = arith.constant 0 : index
    %c0_0 = arith.constant 0 : index
    %0 = vector.load %arg1[%c0, %c0_0] : memref<8x16xbf16, #tpu.memory_space<vmem>>, vector<8x16xbf16>
    %c0_1 = arith.constant 0 : index
    %c0_2 = arith.constant 0 : index
    %1 = vector.load %arg4[%c0_1, %c0_2] : memref<16x512xbf16, #tpu.memory_space<vmem>>, vector<16x512xbf16>
    %cst = arith.constant dense<0.000000e+00> : vector<8x512xf32>
    %2 = tpu.matmul %0, %1, %cst {dimension_numbers = #tpu.dot_dimension_numbers<[1], [0], [0], [1], [0, 0, 1, 1], [], []>} : vector<8x16xbf16>, vector<16x512xbf16>, vector<8x512xf32> -> vector<8x512xf32>
    %c0_3 = arith.constant 0 : index
    %c0_4 = arith.constant 0 : index
    %3 = vector.load %arg2[%c0_3, %c0_4] : memref<8x128xf32, #tpu.memory_space<vmem>>, vector<8x128xf32>
    %4 = arith.truncf %3 : vector<8x128xf32> to vector<8x128xbf16>
    %c0_5 = arith.constant 0 : index
    %c0_6 = arith.constant 0 : index
    %5 = vector.load %arg5[%c0_5, %c0_6] : memref<128x512xbf16, #tpu.memory_space<vmem>>, vector<128x512xbf16>
    %cst_7 = arith.constant dense<0.000000e+00> : vector<8x512xf32>
    %6 = tpu.matmul %4, %5, %cst_7 {dimension_numbers = #tpu.dot_dimension_numbers<[1], [0], [0], [1], [0, 0, 1, 1], [], []>} : vector<8x128xbf16>, vector<128x512xbf16>, vector<8x512xf32> -> vector<8x512xf32>
    %7 = arith.addf %2, %6 : vector<8x512xf32>
    %c0_8 = arith.constant 0 : index
    %c0_9 = arith.constant 0 : index
    %8 = vector.load %arg6[%c0_8, %c0_9] : memref<1x512xf32, #tpu.memory_space<vmem>>, vector<1x512xf32>
    %9 = vector.broadcast %8 : vector<1x512xf32> to vector<8x512xf32>
    %10 = arith.addf %7, %9 : vector<8x512xf32>
    %11 = math.tanh %10 : vector<8x512xf32>
    %12 = vector.extract_strided_slice %11 {offsets = [0, 0], sizes = [8, 128], strides = [1, 1]} : vector<8x512xf32> to vector<8x128xf32>
    %13 = vector.extract_strided_slice %11 {offsets = [0, 128], sizes = [8, 128], strides = [1, 1]} : vector<8x512xf32> to vector<8x128xf32>
    %14 = vector.extract_strided_slice %11 {offsets = [0, 256], sizes = [8, 256], strides = [1, 1]} : vector<8x512xf32> to vector<8x256xf32>
    %cst_10 = arith.constant 5.000000e-01 : f32
    %15 = vector.broadcast %cst_10 : f32 to vector<8x256xf32>
    %16 = arith.mulf %15, %14 : vector<8x256xf32>
    %cst_11 = arith.constant 5.000000e-01 : f32
    %17 = vector.broadcast %cst_11 : f32 to vector<8x256xf32>
    %18 = arith.addf %16, %17 : vector<8x256xf32>
    %19 = vector.extract_strided_slice %18 {offsets = [0, 0], sizes = [8, 128], strides = [1, 1]} : vector<8x256xf32> to vector<8x128xf32>
    %20 = vector.extract_strided_slice %18 {offsets = [0, 128], sizes = [8, 128], strides = [1, 1]} : vector<8x256xf32> to vector<8x128xf32>
    %c0_12 = arith.constant 0 : index
    %c0_13 = arith.constant 0 : index
    %21 = vector.load %arg3[%c0_12, %c0_13] : memref<8x128xf32, #tpu.memory_space<vmem>>, vector<8x128xf32>
    %22 = arith.mulf %21, %20 : vector<8x128xf32>
    %23 = arith.mulf %12, %19 : vector<8x128xf32>
    %24 = arith.addf %22, %23 : vector<8x128xf32>
    %25 = math.tanh %24 : vector<8x128xf32>
    %26 = arith.mulf %25, %13 : vector<8x128xf32>
    %c0_14 = arith.constant 0 : index
    %c0_15 = arith.constant 0 : index
    %27 = vector.load %arg7[%c0_14, %c0_15] : memref<8x128xf32, #tpu.memory_space<vmem>>, vector<8x128xf32>
    tpu.vector_store %arg7[%c0_14, %c0_15], %26 {strides = array<i32>} : memref<8x128xf32, #tpu.memory_space<vmem>>, vector<8x128xf32>,
    %c0_16 = arith.constant 0 : index
    %c0_17 = arith.constant 0 : index
    %28 = vector.load %arg8[%c0_16, %c0_17] : memref<8x128xf32, #tpu.memory_space<vmem>>, vector<8x128xf32>
    tpu.vector_store %arg8[%c0_16, %c0_17], %24 {strides = array<i32>} : memref<8x128xf32, #tpu.memory_space<vmem>>, vector<8x128xf32>,
    return
  }
  func.func @transform_0(%arg0: i32) -> (i32, i32) {
    %c0_i32 = arith.constant 0 : i32
    %c0_i32_0 = arith.constant 0 : i32
    return %arg0, %c0_i32 : i32, i32
  }
  func.func @transform_1(%arg0: i32) -> (i32, i32) {
    %c0_i32 = arith.constant 0 : i32
    %c0_i32_0 = arith.constant 0 : i32
    return %arg0, %c0_i32 : i32, i32
  }
  func.func @transform_2(%arg0: i32) -> (i32, i32) {
    %c0_i32 = arith.constant 0 : i32
    %c0_i32_0 = arith.constant 0 : i32
    return %arg0, %c0_i32 : i32, i32
  }
  func.func @transform_3(%arg0: i32) -> (i32, i32) {
    %c0_i32 = arith.constant 0 : i32
    %c0_i32_0 = arith.constant 0 : i32
    %c0_i32_1 = arith.constant 0 : i32
    return %c0_i32, %c0_i32_0 : i32, i32
  }
  func.func @transform_4(%arg0: i32) -> (i32, i32) {
    %c0_i32 = arith.constant 0 : i32
    %c0_i32_0 = arith.constant 0 : i32
    %c0_i32_1 = arith.constant 0 : i32
    return %c0_i32, %c0_i32_0 : i32, i32
  }
  func.func @transform_5(%arg0: i32) -> (i32, i32) {
    %c0_i32 = arith.constant 0 : i32
    %c0_i32_0 = arith.constant 0 : i32
    %c0_i32_1 = arith.constant 0 : i32
    return %c0_i32, %c0_i32_0 : i32, i32
  }
  func.func @transform_6(%arg0: i32) -> (i32, i32) {
    %c0_i32 = arith.constant 0 : i32
    %c0_i32_0 = arith.constant 0 : i32
    return %arg0, %c0_i32 : i32, i32
  }
  func.func @transform_7(%arg0: i32) -> (i32, i32) {
    %c0_i32 = arith.constant 0 : i32
    %c0_i32_0 = arith.constant 0 : i32
    return %arg0, %c0_i32 : i32, i32
  }
}

</mosaic_0001>

<bundles_post_ra>
// kernel: tpu_custom_call.1
= control target key start
LH: loop header
LB: loop body
LE: loop exit
PB: predicated region body
PF: predicated region fallthrough
CT: control target
= control target key end

     0   :  { %s1816_s0 = inlined_call_operand.hbm [shape: bf16[16,16], index: 0, kind: input, shape index: {}]   ;;  %s1817_s1 = inlined_call_operand.hbm [shape: f32[16,128], index: 1, kind: input, shape index: {}]   ;;  %s1818_s2 = inlined_call_operand.hbm [shape: f32[16,128], index: 2, kind: input, shape index: {}]   ;;  %s1819_s3 = inlined_call_operand.hbm [shape: bf16[16,512], index: 3, kind: input, shape index: {}]   ;;  %s1820_s4 = inlined_call_operand.hbm [shape: bf16[128,512], index: 4, kind: input, shape index: {}]   ;;  %s1821_s5 = inlined_call_operand.vmem [shape: f32[1,512], index: 5, kind: input, shape index: {}]   ;;  %s1822_s6 = inlined_call_operand.hbm [shape: f32[16,128], index: 6, kind: output, shape index: {0}]   ;;  %s1823_s7 = inlined_call_operand.hbm [shape: f32[16,128], index: 7, kind: output, shape index: {1}]  }
   0x1   :  { %1834 = sst [smem:[#allocation24_spill]] %s1817_s1 }
   0x2   :  { %1835 = sst [smem:[#allocation25_spill]] %s1819_s3 }
   0x3   :  { %1836 = sst [smem:[#allocation26_spill]] %s1820_s4 }
   0x4   :  { %1837 = sst [smem:[#allocation27_spill]] %s1822_s6 }
   0x5   :  { %13 = vsyncpa [#allocation3], 0 }
   0x6   :  { %15 = vsyncpa [#allocation3 + $0x1], 0 }
   0x7   :  { %16 = vsyncpa [#allocation6], 0 }
   0x8   :  { %18 = vsyncpa [#allocation6 + $0x1], 0 }
   0x9   :  { %19 = vsyncpa [#allocation9], 0 }
   0xa   :  { %20 = vsyncpa [#allocation4], 0 }
   0xb   :  { %22 = vsyncpa [#allocation4 + $0x1], 0 }
   0xc   :  { %23 = vsyncpa [#allocation13], 0 }
   0xd   :  { %25 = vsyncpa [#allocation13 + $0x1], 0  ;;  %s1578_s24 = smov 0   ;;  %s1580_s25 = smov 0  }
   0xe   :  { %s1582_s26 = smov 0   ;;  %s1584_s27 = smov 0  }
   0xf LB: > { %1838 = sst [smem:[#allocation19_spill]] %s1520_s24  ;;  %s1602_s8 = sadd.s32 4294967295, %s1532_s27   ;;  %s1532_s27 = sphi %s1584_s27, %s1862_s27   ;;  %s1528_s26 = sphi %s1582_s26, %s1864_s26   ;;  %s1524_s25 = sphi %s1580_s25, %s1866_s25   ;;  %s1520_s24 = sphi %s1578_s24, %s1865_s24  }
  0x10   : > { %1839 = sst [smem:[#allocation20_spill]] %s1528_s26  ;;  %p974_p0 = scmp.ge.s32.totalorder %s1532_s27, 1 }
  0x11   : > { %s1840_s3 = sld [smem:[#allocation25_spill]]  ;;  %p1828_p1 = scmp.eq.s32.totalorder %s1602_s8, 0 }
  0x12   : > { %p229_p2 = scmp.lt.s32.totalorder %s1532_s27, 3  ;;  %s1534_s10 = smov [#allocation8]  }
  0x13   : > { %s242_s11 = sshll.u32 %s1534_s10, 4  ;;  %s1824_s13 = smov 256   ;;  %s243_s11 = int_to_ptr.vmem [resolvable:$true] %s242_s11 }
  0x14   : > { %p1607_p3 = pnand %p974_p0, %p229_p2  ;;  %s1825_s14 = smov 16  }
  0x15   : > { %s973_s15 = sadd.s32 4294967294, %s1532_s27   ;;  %s1627_s16 = sadd.s32 1, %s1532_s27  }
  0x16   : > { %p1200_p4 = pneg %p1607_p3  ;;  %1843 = sst [smem:[#allocation21_spill]] %s1627_s16 }
  0x17   : > { %s240_s30 = sshll.u32 %s1840_s3, 4  ;;  %s38_s17 = sadd.s32 1, %s1528_s26  ;;  %s241_s30 = int_to_ptr.hbm [resolvable:$true] %s240_s30 }
  0x18   : > { %p1616_p6 = pnand %p1200_p4, %p1828_p1  ;;  %s35_s18 = ssub.s32 %s1532_s27, %s1627_s16 }
  0x19   : > { %p45_p7 = scmp.ne.s32.totalorder %s1528_s26, %s1524_s25  ;;  %p36_p8 = scmp.eq.s32.totalorder %s35_s18, 0 }
  0x1a   : > { %1203 = dma.hbm_to_vmem [thread:$0]  (!%p1616_p6), %s241_s30, 512, %s243_s11, [#allocation9], %s1824_s13, %s1824_s13, %s1825_s14  }
  0x1b   : > { %p46_p9 = scmp.eq.s32.totalorder %s1532_s27, 0  ;;  %p51_p10 = scmp.ne.s32.totalorder %s1524_s25, %s1520_s24 }
  0x1c   : > { %p190_p11 = scmp.eq.s32.totalorder %s1602_s8, 1  ;;  %p196_p2 = scmp.eq.s32.totalorder %s973_s15, 1 }
  0x1d   : > { %s1639_s19 = scalar_select %p36_p8, %s1528_s26, %s38_s17  }
  0x1e   : > { %p47_p12 = por %p46_p9, %p45_p7  ;;  %p1643_p13 = por %p1828_p1, %p51_p10 }
  0x1f   : > { %1844 = sst [smem:[#allocation22_spill]] %s1639_s19  ;;  %p1647_p0 = por %p190_p11, %p45_p7 }
  0x20   : > { %p1226_p4 = scmp.lt.s32.totalorder %s1532_s27, 2  ;;  %s1653_s22 = sand.u32 1, %s1528_s26  }
  0x21   : > { %p1655_p5 = por %p196_p2, %p51_p10  ;;  %s292_s28 = sand.u32 1, %s1532_s27  }
  0x22   : > { %p1660_p8 = pnand %p1226_p4, %p47_p12  ;;  %s1827_s30 = sshll.u32 %s1653_s22, 3 }
  0x23   : > { %s1847_s23 = scalar_select %p1655_p5, 1, 0 }
  0x24   : > { %s981_s10 = sshll.u32 %s1532_s27, 3  ;;  %s1850_s1 = sld [smem:[#allocation24_spill]] }
  0x25   : > { %1848 = sst [smem:[#allocation23_spill]] %s1847_s23  ;;  %s296_s18 = scalar_lea.vmem [#allocation5], %s1827_s30 }
  0x26   : > { %s304_s13 = sshll.u32 %s296_s18, 4  ;;  %s1671_s3 = scalar_lea.sflag [#allocation6], %s292_s28  ;;  %s305_s13 = int_to_ptr.vmem [resolvable:$true] %s304_s13 }
  0x27   : > { %p1310_p9 = pneg %p1660_p8 }
  0x2a   : > { %s300_s17 = scalar_lea.hbm %s1850_s1, %s981_s10  ;;  %s1313_s30 = scalar_lea.hbm %s1850_s1, 16 }
  0x2b   : > { %s302_s14 = sshll.u32 %s300_s17, 4  ;;  %s303_s14 = int_to_ptr.hbm [resolvable:$true] %s302_s14 }
  0x2c   : > { %s1306_s19 = sshra.s32 %s303_s14, 4  ;;  %s1307_s19 = int_to_ptr.hbm [resolvable:$true] %s1306_s19 }
  0x2d   : > { %s1308_s26 = scalar_lea.hbm %s1307_s19, 8  ;;  %p1314_p12 = scmp.lt.s32.totalorder %s1307_s19, %s1850_s1 }
  0x2e   : > { %p1309_p7 = scmp.ne.s32.totalorder %s1307_s19, %s1308_s26  ;;  %p1315_p2 = scmp.lt.s32.totalorder %s1313_s30, %s1308_s26 }
  0x30   : > { %p1311_p10 = pnand %p1310_p9, %p1309_p7  ;;  %p1316_p4 = por %p1315_p2, %p1314_p12 }
  0x32   : > { %p1312_p11 = pneg %p1311_p10 }
  0x34   : > { %p1317_p1 = pnand %p1316_p4, %p1312_p11 }
  0x36   : > { %1320 = shalt.err (!%p1317_p1)
}
  0x37   : > { %1213 = dma.hbm_to_vmem [thread:$0]  (!%p1660_p8), %s303_s14, 128, %s305_s13, %s1671_s3  }
  0x38   : > { %s1690_s11 = scalar_lea.hbm %s1818_s2, %s981_s10  ;;  %s1851_s4 = sld [smem:[#allocation26_spill]] }
  0x39   : > { %s1537_s19 = smov [#allocation10]   ;;  %s978_s18 = sshll.u32 %s1653_s22, 2 }
  0x3a   : > { %s256_s30 = sshll.u32 %s1537_s19, 4  ;;  %s1852_s17 = smov 16   ;;  %s257_s30 = int_to_ptr.vmem [resolvable:$true] %s256_s30 }
  0x3b   : > { %s1853_s13 = smov 256   ;;  %s979_s14 = sshll.u32 %s1532_s27, 2 }
  0x3c   : > { %s281_s28 = scalar_lea.hbm %s1816_s0, %s979_s14  ;;  %s277_s23 = scalar_lea.vmem [#allocation2], %s978_s18 }
  0x3d   : > { %s285_s15 = sshll.u32 %s277_s23, 4  ;;  %s283_s1 = sshll.u32 %s281_s28, 4  ;;  %s286_s15 = int_to_ptr.vmem [resolvable:$true] %s285_s15  ;;  %s284_s1 = int_to_ptr.hbm [resolvable:$true] %s283_s1 }
  0x3e   : > { %s254_s26 = sshll.u32 %s1851_s4, 4  ;;  %s321_s4 = sshll.u32 %s1690_s11, 4  ;;  %s255_s26 = int_to_ptr.hbm [resolvable:$true] %s254_s26  ;;  %s322_s4 = int_to_ptr.hbm [resolvable:$true] %s321_s4 }
  0x3f   : > { %1206 = dma.hbm_to_vmem [thread:$0]  (!%p1616_p6), %s255_s26, 4096, %s257_s30, [#allocation9], %s1853_s13, %s1853_s13, %s1852_s17  }
  0x40   : > { %s274_s19 = scalar_lea.sflag [#allocation3], %s1653_s22  ;;  %s1366_s24 = sshra.s32 %s284_s1, 4  ;;  %s1367_s24 = int_to_ptr.hbm [resolvable:$true] %s1366_s24 }
  0x41   : > { %s1368_s6 = scalar_lea.hbm %s1367_s24, 4  ;;  %s1373_s30 = scalar_lea.hbm %s1816_s0, 8 }
  0x42   : > { %p1369_p1 = scmp.ne.s32.totalorder %s1367_s24, %s1368_s6  ;;  %p1374_p10 = scmp.lt.s32.totalorder %s1367_s24, %s1816_s0 }
  0x43   : > { %p1375_p11 = scmp.lt.s32.totalorder %s1373_s30, %s1368_s6 }
  0x44   : > { %p1371_p7 = pnand %p1369_p1, %p1310_p9 }
  0x45   : > { %p1376_p12 = por %p1375_p11, %p1374_p10 }
  0x46   : > { %p1372_p6 = pneg %p1371_p7 }
  0x48   : > { %p1377_p2 = pnand %p1376_p12, %p1372_p6 }
  0x4a   : > { %1380 = shalt.err (!%p1377_p2)
}
  0x4b   : > { %1210 = dma.hbm_to_vmem [thread:$0]  (!%p1660_p8), %s284_s1, 64, %s286_s15, %s274_s19  }
  0x4c   : > { %s1854_s11 = sshll.u32 %s1653_s22, 3  ;;  %s1396_s16 = sshra.s32 %s322_s4, 4  ;;  %s1397_s16 = int_to_ptr.hbm [resolvable:$true] %s1396_s16 }
  0x4d   : > { %s315_s13 = scalar_lea.vmem [#allocation7], %s1854_s11  ;;  %s1398_s10 = scalar_lea.hbm %s1397_s16, 8 }
  0x4e   : > { %s323_s14 = sshll.u32 %s315_s13, 4  ;;  %p1399_p4 = scmp.ne.s32.totalorder %s1397_s16, %s1398_s10  ;;  %s324_s14 = int_to_ptr.vmem [resolvable:$true] %s323_s14 }
  0x4f   : > { %s1403_s28 = scalar_lea.hbm %s1818_s2, 16  ;;  %p1404_p6 = scmp.lt.s32.totalorder %s1397_s16, %s1818_s2 }
  0x50   : > { %p1401_p1 = pnand %p1399_p4, %p1310_p9  ;;  %p1405_p10 = scmp.lt.s32.totalorder %s1403_s28, %s1398_s10 }
  0x52   : > { %p1402_p7 = pneg %p1401_p1  ;;  %p1406_p11 = por %p1405_p10, %p1404_p6 }
  0x54   : > { %p1407_p12 = pnand %p1406_p11, %p1402_p7 }
  0x56   : > { %1410 = shalt.err (!%p1407_p12)
}
  0x57   : > { %1216 = dma.hbm_to_vmem [thread:$0]  (!%p1660_p8), %s322_s4, 128, %s324_s14, %s1671_s3  }
  0x58   : > { %332 = sbr.rel (%p1607_p3) target bundleno = 320 (0x140), region = 44  ;;  %s1735_s1 = sand.u32 (!%p1607_p3), 1, %s1524_s25  }
  0x59   : > { %s985_s22 = sshll.u32 (!%p1607_p3), %s1735_s1, 2  ;;  %s335_s15 = scalar_lea.sflag (!%p1607_p3), [#allocation3], %s1735_s1 }
  0x5a   : > { %s1739_s19 = scalar_lea.vmem (!%p1607_p3), [#allocation2], %s985_s22 }
  0x5d   : > { %1499 = dma.done.wait (%p1643_p13), %s335_s15, 64  }
  0x5e   : > { %1501 = vsyncadd (%p1643_p13), %s335_s15, 4294967232  ;;  %s344_s3 = sand.u32 1, %s1602_s8   ;;  %s1747_s4 = sshll.u32 %s1735_s1, 3 }
  0x5f   : > { %s345_s9 = scalar_lea.sflag [#allocation6], %s344_s3  ;;  %s348_s29 = scalar_lea.vmem [#allocation5], %s1747_s4 }
  0x60   : > { %1503 = dma.done.wait (%p1643_p13), %s345_s9, 256  }
  0x61   : > { %1505 = vsyncadd (%p1643_p13), %s345_s9, 4294967040  ;;  %s358_s26 = scalar_lea.vmem [#allocation7], %s1747_s4  ;;  %p1855_p3 = scmp.eq.s32.totalorder %s1602_s8, 0 }
  0x63   : > { %1507 = dma.done.wait (%p1855_p3), [#allocation9], 4608   ;;  %p1856_p8 = pmov %p1855_p3 }
  0x64   : > { %v1106_v0 = vld [vmem:[#allocation10 + $0xe0] sm:$0xf]  ;;  %v1180_v1 = vld [vmem:[#allocation10 + $0xec] sm:$0xf0]  ;;  %v1114_v2 = vld [vmem:[#allocation10 + $0xe8] sm:$0xf] }
  0x65   : > { %1509 = vsyncadd (%p1856_p8), [#allocation9], 4294962688  ;;  %v1107_v3 = vor.u32 %v1180_v1, %v1106_v0  ;;  %v1181_v4 = vld [vmem:[#allocation10 + $0xf4] sm:$0xf0]  ;;  %v1179_v5 = vld [vmem:[#allocation10 + $0xec] sm:$0xf] }
  0x66   : > { %v1116_v6 = vld [vmem:[#allocation10 + $0xf8] sm:$0xf0]  ;;  %v1115_v7 = vor.u32 %v1181_v4, %v1114_v2  ;;  %v1090_v9 = vld [vmem:[#allocation10 + $0xc0] sm:$0xf]  ;;  %v1176_v10 = vld [vmem:[#allocation10 + $0xcc] sm:$0xf0] }
  0x67   : > { %v1119_v8 = vor.u32 %v1179_v5, %v1116_v6  ;;  %v1098_v11 = vld [vmem:[#allocation10 + $0xc8] sm:$0xf]  ;;  %615 = vmatpush.bf16.msra.mxu0 %v1107_v3  ;;  %v1091_v12 = vor.u32 %v1176_v10, %v1090_v9  ;;  %v1177_v13 = vld [vmem:[#allocation10 + $0xd4] sm:$0xf0]  ;;  %v1175_v14 = vld [vmem:[#allocation10 + $0xcc] sm:$0xf] }
  0x68   : > { %v1100_v15 = vld [vmem:[#allocation10 + $0xd8] sm:$0xf0]  ;;  %641 = vmatpush.bf16.msra.mxu2 %v1115_v7  ;;  %v1099_v16 = vor.u32 %v1177_v13, %v1098_v11  ;;  %v1178_v18 = vld [vmem:[#allocation10 + $0xe4] sm:$0xf]  ;;  %v1108_v19 = vld [vmem:[#allocation10 + $0xf0] sm:$0xf0] }
  0x69   : > { %654 = vmatpush.bf16.msra.mxu3 %v1119_v8  ;;  %v1103_v17 = vor.u32 %v1175_v14, %v1100_v15  ;;  %v1074_v20 = vld [vmem:[#allocation10 + $0xa0] sm:$0xf]  ;;  %v1111_v21 = vor.u32 %v1178_v18, %v1108_v19  ;;  %v1172_v22 = vld [vmem:[#allocation10 + $0xac] sm:$0xf0]  ;;  %v1082_v23 = vld [vmem:[#allocation10 + $0xa8] sm:$0xf] }
  0x6a   : > { %v1173_v24 = vld [vmem:[#allocation10 + $0xb4] sm:$0xf0]  ;;  %v1171_v25 = vld [vmem:[#allocation10 + $0xac] sm:$0xf]  ;;  %v1084_v26 = vld [vmem:[#allocation10 + $0xb8] sm:$0xf0]  ;;  %v1075_v28 = vor.u32 %v1172_v22, %v1074_v20 }
  0x6b   : > { %v1174_v27 = vld [vmem:[#allocation10 + $0xc4] sm:$0xf]  ;;  %616 = vmatpush.bf16.msra.mxu0 %v1091_v12  ;;  %628 = vmatpush.bf16.msra.mxu1 %v1111_v21  ;;  %v1092_v29 = vld [vmem:[#allocation10 + $0xd0] sm:$0xf0]  ;;  %v1058_v30 = vld [vmem:[#allocation10 + $0x80] sm:$0xf]  ;;  %v1083_v32 = vor.u32 %v1173_v24, %v1082_v23  ;;  %v1087_v33 = vor.u32 %v1171_v25, %v1084_v26 }
  0x6c   : > { %v1168_v31 = vld [vmem:[#allocation10 + $0x8c] sm:$0xf0]  ;;  %642 = vmatpush.bf16.msra.mxu2 %v1099_v16  ;;  %v1095_v34 = vor.u32 %v1174_v27, %v1092_v29  ;;  %v1066_v35 = vld [vmem:[#allocation10 + $0x88] sm:$0xf]  ;;  %v1169_v36 = vld [vmem:[#allocation10 + $0x94] sm:$0xf0] }
  0x6d   : > { %655 = vmatpush.bf16.msra.mxu3 %v1103_v17  ;;  %v1167_v37 = vld [vmem:[#allocation10 + $0x8c] sm:$0xf]  ;;  %v1068_v38 = vld [vmem:[#allocation10 + $0x98] sm:$0xf0]  ;;  %v1170_v39 = vld [vmem:[#allocation10 + $0xa4] sm:$0xf]  ;;  %v1059_v41 = vor.u32 %v1168_v31, %v1058_v30  ;;  %v1067_v45 = vor.u32 %v1169_v36, %v1066_v35 }
  0x6e   : > { %v1076_v40 = vld [vmem:[#allocation10 + $0xb0] sm:$0xf0]  ;;  %v1042_v43 = vld [vmem:[#allocation10 + $0x60] sm:$0xf]  ;;  %v1164_v44 = vld [vmem:[#allocation10 + $0x6c] sm:$0xf0]  ;;  %v1071_v46 = vor.u32 %v1167_v37, %v1068_v38 }
  0x6f   : > { %617 = vmatpush.bf16.msra.mxu0 %v1075_v28  ;;  %629 = vmatpush.bf16.msra.mxu1 %v1095_v34  ;;  %v1079_v42 = vor.u32 %v1170_v39, %v1076_v40  ;;  %v1050_v47 = vld [vmem:[#allocation10 + $0x68] sm:$0xf]  ;;  %v1166_v48 = vld [vmem:[#allocation10 + $0x84] sm:$0xf]  ;;  %v1060_v49 = vld [vmem:[#allocation10 + $0x90] sm:$0xf0]  ;;  %v1043_v53 = vor.u32 %v1164_v44, %v1042_v43 }
  0x70   : > { %643 = vmatpush.bf16.msra.mxu2 %v1083_v32  ;;  %v1165_v50 = vld [vmem:[#allocation10 + $0x74] sm:$0xf0]  ;;  %v1163_v51 = vld [vmem:[#allocation10 + $0x6c] sm:$0xf]  ;;  %v1052_v52 = vld [vmem:[#allocation10 + $0x78] sm:$0xf0]  ;;  %v1063_v54 = vor.u32 %v1166_v48, %v1060_v49 }
  0x71   : > { %656 = vmatpush.bf16.msra.mxu3 %v1087_v33  ;;  %v1026_v55 = vld [vmem:[#allocation10 + $0x40] sm:$0xf]  ;;  %v1160_v56 = vld [vmem:[#allocation10 + $0x4c] sm:$0xf0]  ;;  %v1051_v57 = vor.u32 %v1165_v50, %v1050_v47  ;;  %v1055_v58 = vor.u32 %v1163_v51, %v1052_v52  ;;  %v1034_v59 = vld [vmem:[#allocation10 + $0x48] sm:$0xf] }
  0x72   : > { %v1162_v60 = vld [vmem:[#allocation10 + $0x64] sm:$0xf]  ;;  %v1044_v61 = vld [vmem:[#allocation10 + $0x70] sm:$0xf0]  ;;  %v1161_v62 = vld [vmem:[#allocation10 + $0x54] sm:$0xf0]  ;;  %v1027_v1 = vor.u32 %v1160_v56, %v1026_v55 }
  0x73   : > { %618 = vmatpush.bf16.msra.mxu0 %v1059_v41  ;;  %630 = vmatpush.bf16.msra.mxu1 %v1079_v42  ;;  %v1159_v63 = vld [vmem:[#allocation10 + $0x4c] sm:$0xf]  ;;  %v1036_v0 = vld [vmem:[#allocation10 + $0x58] sm:$0xf0]  ;;  %v1047_v2 = vor.u32 %v1162_v60, %v1044_v61  ;;  %v1010_v3 = vld [vmem:[#allocation10 + $0x20] sm:$0xf]  ;;  %v1035_v5 = vor.u32 %v1161_v62, %v1034_v59 }
  0x74   : > { %644 = vmatpush.bf16.msra.mxu2 %v1067_v45  ;;  %v1156_v4 = vld [vmem:[#allocation10 + $0x2c] sm:$0xf0]  ;;  %v1039_v6 = vor.u32 %v1159_v63, %v1036_v0  ;;  %v1018_v7 = vld [vmem:[#allocation10 + $0x28] sm:$0xf]  ;;  %v1158_v8 = vld [vmem:[#allocation10 + $0x44] sm:$0xf] }
  0x75   : > { %657 = vmatpush.bf16.msra.mxu3 %v1071_v46  ;;  %v1028_v9 = vld [vmem:[#allocation10 + $0x50] sm:$0xf0]  ;;  %v1157_v10 = vld [vmem:[#allocation10 + $0x34] sm:$0xf0]  ;;  %v1155_v11 = vld [vmem:[#allocation10 + $0x2c] sm:$0xf]  ;;  %v1011_v13 = vor.u32 %v1156_v4, %v1010_v3 }
  0x76   : > { %v1020_v12 = vld [vmem:[#allocation10 + $0x38] sm:$0xf0]  ;;  %v1031_v14 = vor.u32 %v1158_v8, %v1028_v9  ;;  %v994_v15 = vld [vmem:[#allocation10] sm:$0xf]  ;;  %v1152_v16 = vld [vmem:[#allocation10 + $0xc] sm:$0xf0]  ;;  %v1019_v18 = vor.u32 %v1157_v10, %v1018_v7 }
  0x77   : > { %619 = vmatpush.bf16.msra.mxu0 %v1043_v53  ;;  %631 = vmatpush.bf16.msra.mxu1 %v1063_v54  ;;  %v1002_v17 = vld [vmem:[#allocation10 + $0x8] sm:$0xf]  ;;  %v1023_v19 = vor.u32 %v1155_v11, %v1020_v12  ;;  %v1153_v20 = vld [vmem:[#allocation10 + $0x14] sm:$0xf0]  ;;  %v1154_v21 = vld [vmem:[#allocation10 + $0x24] sm:$0xf]  ;;  %v995_v29 = vor.u32 %v1152_v16, %v994_v15 }
  0x78   : > { %645 = vmatpush.bf16.msra.mxu2 %v1051_v57  ;;  %v1012_v22 = vld [vmem:[#allocation10 + $0x30] sm:$0xf0]  ;;  %v1151_v23 = vld [vmem:[#allocation10 + $0xc] sm:$0xf]  ;;  %v1004_v24 = vld [vmem:[#allocation10 + $0x18] sm:$0xf0]  ;;  %v1003_v32 = vor.u32 %v1153_v20, %v1002_v17 }
  0x79   : > { %658 = vmatpush.bf16.msra.mxu3 %v1055_v58  ;;  %v1130_v25 = vld [vmem:[#allocation8 + $0x8] sm:$0xf]  ;;  %v1149_v26 = vld [vmem:[#allocation8 + $0x14] sm:$0xf0]  ;;  %v1147_v27 = vld [vmem:[#allocation8 + $0xc] sm:$0xf]  ;;  %v1015_v30 = vor.u32 %v1154_v21, %v1012_v22  ;;  %v1007_v33 = vor.u32 %v1151_v23, %v1004_v24 }
  0x7a   : > { %v1132_v28 = vld [vmem:[#allocation8 + $0x18] sm:$0xf0]  ;;  %v421_v31 = vld [vmem:[%s348_s29] sm:$0xff]  ;;  %v1131_v35 = vor.u32 %v1149_v26, %v1130_v25  ;;  %v996_v37 = vld [vmem:[#allocation10 + $0x10] sm:$0xf0]  ;;  %vm687_vm0 = vcmask 130048  }
  0x7b   : > { %620 = vmatpush.bf16.msra.mxu0 %v1027_v1  ;;  %632 = vmatpush.bf16.msra.mxu1 %v1047_v2  ;;  %v1150_v34 = vld [vmem:[#allocation10 + $0x4] sm:$0xf]  ;;  %v1135_v36 = vor.u32 %v1147_v27, %v1132_v28  ;;  %v1122_v38 = vld [vmem:[#allocation8] sm:$0xf]  ;;  %v1148_v39 = vld [vmem:[#allocation8 + $0xc] sm:$0xf0]  ;;  %v422_v40 = vpack.c.bf16 %v421_v31, %v421_v31 }
  0x7c   : > { %646 = vmatpush.bf16.msra.mxu2 %v1035_v5  ;;  %v1146_v41 = vld [vmem:[#allocation8 + $0x4] sm:$0xf]  ;;  %v1124_v42 = vld [vmem:[#allocation8 + $0x10] sm:$0xf0]  ;;  %v999_v43 = vor.u32 %v1150_v34, %v996_v37  ;;  %v1123_v44 = vor.u32 %v1148_v39, %v1122_v38  ;;  %v416_v46 = vld [vmem:[%s1739_s19] sm:$0xf] }
  0x7d   : > { %659 = vmatpush.bf16.msra.mxu3 %v1039_v6  ;;  %v1127_v45 = vor.u32 %v1146_v41, %v1124_v42  ;;  %v743_v56 = vld [vmem:[%s1821_s5] sm:$0xf]  ;;  %s1142_s17 = sshll.u32 %s1602_s8, 3  ;;  %s414_s14 = scalar_lea.vmem [#allocation12], %s1747_s4 }
  0x7e   : > { %v747_v58 = vperm.slane %v743_v56, 2  ;;  %v748_v59 = vperm.slane %v743_v56, 3  ;;  %v745_v63 = vperm.slane %v743_v56, 0  ;;  %v746_v12 = vperm.slane %v743_v56, 1  ;;  %s803_s13 = scalar_lea.hbm %s1823_s7, %s1142_s17  ;;  %v765_v16 = vld [vmem:[%s358_s26] sm:$0xff]  ;;  %s805_s8 = sshll.u32 %s414_s14, 4  ;;  %s806_s8 = int_to_ptr.vmem [resolvable:$true] %s805_s8 }
  0x7f   : > { %621 = vmatpush.bf16.msra.mxu0 %v1011_v13  ;;  %633 = vmatpush.bf16.msra.mxu1 %v1031_v14  ;;  %s807_s16 = sshll.u32 %s803_s13, 4  ;;  %s1857_s24 = sld [smem:[#allocation27_spill]]  ;;  %s808_s16 = int_to_ptr.hbm [resolvable:$true] %s807_s16 }
  0x80   : > { %647 = vmatpush.bf16.msra.mxu2 %v1019_v18  ;;  %s779_s12 = scalar_lea.sflag [#allocation13], %s1735_s1  ;;  %s1440_s22 = sshra.s32 %s808_s16, 4  ;;  %s1441_s22 = int_to_ptr.hbm [resolvable:$true] %s1440_s22 }
  0x81   : > { %660 = vmatpush.bf16.msra.mxu3 %v1023_v19  ;;  %s1442_s15 = scalar_lea.hbm %s1441_s22, 8  ;;  %s1446_s9 = scalar_lea.hbm %s1823_s7, 16 }
  0x82   : > { %p1443_p13 = scmp.ne.s32.totalorder %s1441_s22, %s1442_s15  ;;  %p1447_p4 = scmp.lt.s32.totalorder %s1441_s22, %s1823_s7 }
  0x83   : > { %622 = vmatpush.bf16.msra.mxu0 %v995_v29  ;;  %634 = vmatpush.bf16.msra.mxu1 %v1015_v30  ;;  %p1448_p1 = scmp.lt.s32.totalorder %s1446_s9, %s1442_s15 }
  0x84   : > { %648 = vmatpush.bf16.msra.mxu2 %v1003_v32  ;;  %p1444_p9 = pnand %p1443_p13, %p1647_p0 }
  0x85   : > { %661 = vmatpush.bf16.msra.mxu3 %v1007_v33  ;;  %s1858_s28 = smov %s1857_s24  ;;  %s789_s23 = scalar_lea.hbm %s1857_s24, %s1142_s17 }
  0x86   : > { %623 = vmatmul.bf16.vlgmr.msra.gmra.mxu0 %v422_v40  ;;  %p1445_p2 = pneg %p1444_p9  ;;  %p1449_p7 = por %p1448_p1, %p1447_p4 }
  0x87   : > { %649 = vmatmul.bf16.vlgmr.msra.gmra.mxu2 %v422_v40  ;;  %635 = vmatpush.bf16.msra.mxu1 %v999_v43 }
  0x88   : > { %724 = vmatpush.bf16.msrb.mxu2 %v1131_v35  ;;  %662 = vmatmul.bf16.vlgmr.msra.gmra.mxu3 %v422_v40  ;;  %p1450_p6 = pnand %p1449_p7, %p1445_p2 }
  0x89   : > { %737 = vmatpush.bf16.msrb.mxu3 %v1135_v36  ;;  %698 = vmatpush.bf16.msrb.mxu0 %v1123_v44 }
  0x8a   : > { %636 = vmatmul.bf16.vlgmr.msra.gmra.mxu1 %v422_v40 }
  0x8b   : > { %711 = vmatpush.bf16.msrb.mxu1 %v1127_v45 }
  0x96   : > { %1136 = vmatmul.msk.bf16.vlgmr.msrb.gmra.mxu0 %vm687_vm0, %v416_v46 }
  0x97   : > { %1138 = vmatmul.msk.bf16.vlgmr.msrb.gmra.mxu2 %vm687_vm0, %v416_v46 }
  0x98   : > { %1139 = vmatmul.msk.bf16.vlgmr.msrb.gmra.mxu3 %vm687_vm0, %v416_v46 }
  0x9a   : > { %1137 = vmatmul.msk.bf16.vlgmr.msrb.gmra.mxu1 %vm687_vm0, %v416_v46 }
 0x103   : > { %v624_v47 = vpop.f32.mrf.mxu0 }
 0x107   : > { %v637_v48 = vpop.f32.mrf.mxu1 }
 0x10a   : > { %v650_v49 = vpop.f32.mrf.mxu2 }
 0x10b   : > { %v663_v50 = vpop.f32.mrf.mxu3  ;;  %v626_v51 = vpop.f32.mrf.mxu0 }
 0x10f   : > { %v639_v52 = vpop.f32.mrf.mxu1 }
 0x112   : > { %v652_v53 = vpop.f32.mrf.mxu2 }
 0x113   : > { %v665_v54 = vpop.f32.mrf.mxu3  ;;  %v700_v55 = vpop.f32.mrf.mxu0 }
 0x114   : > { %v701_v62 = vadd.f32 %v700_v55, %v624_v47 }
 0x116   : > { %v753_v5 = vadd.f32 %v745_v63, %v701_v62 }
 0x117   : > { %v713_v57 = vpop.f32.mrf.mxu1 }
 0x118   : > { %v714_v11 = vadd.f32 %v713_v57, %v637_v48 }
 0x11a   : > { %v726_v60 = vpop.f32.mrf.mxu2  ;;  %v754_v19 = vadd.f32 %v746_v12, %v714_v11 }
 0x11b   : > { %v739_v61 = vpop.f32.mrf.mxu3  ;;  %v727_v0 = vadd.f32 %v726_v60, %v650_v49  ;;  %v702_v2 = vpop.f32.mrf.mxu0 }
 0x11c   : > { %v740_v1 = vadd.f32 %v739_v61, %v663_v50 }
 0x11d   : > { %v755_v3 = vadd.f32 %v747_v58, %v727_v0 }
 0x11e   : > { %v756_v4 = vadd.f32 %v748_v59, %v740_v1 }
 0x11f   : > { %1266 = vtanh.f32 %v755_v3  ;;  %v715_v6 = vpop.f32.mrf.mxu1 }
 0x120   : > { %1268 = vtanh.f32 %v756_v4 }
 0x121   : > { %1270 = vtanh.f32 %v753_v5 }
 0x122   : > { %v728_v7 = vpop.f32.mrf.mxu2  ;;  %1272 = vtanh.f32 %v754_v19 }
 0x123   : > { %v741_v8 = vpop.f32.mrf.mxu3 }
 0x125   : > { %v1267_v9 = vpop.eup %1266 }
 0x126   : > { %v1269_v10 = vpop.eup %1268  ;;  %v761_v13 = vmul.f32 0.5, %v1267_v9 }
 0x127   : > { %v762_v14 = vmul.f32 0.5, %v1269_v10  ;;  %v1271_v17 = vpop.eup %1270 }
 0x128   : > { %v763_v15 = vadd.f32 0.5, %v761_v13 }
 0x129   : > { %v764_v18 = vadd.f32 0.5, %v762_v14 }
 0x12a   : > { %v767_v20 = vmul.f32 %v1271_v17, %v763_v15 }
 0x12b   : > { %v766_v21 = vmul.f32 %v765_v16, %v764_v18 }
 0x12d   : > { %v768_v22 = vadd.f32 %v767_v20, %v766_v21 }
 0x12f   : > { %1274 = vtanh.f32 %v768_v22  ;;  %772 = vst [vmem:[%s414_s14] sm:$0xff] %v768_v22 }
 0x130   : > { %1453 = shalt.err (!%p1450_p6)
}
 0x131   : > { %1197 = dma.vmem_to_hbm [thread:$0]  (%p1647_p0), %s806_s8, 128, %s808_s16, %s779_s12   ;;  %v1273_v23 = vpop.eup %1272 }
 0x132   : > { %s407_s20 = scalar_lea.vmem [#allocation11], %s1747_s4  ;;  %s793_s17 = sshll.u32 %s789_s23, 4  ;;  %s794_s17 = int_to_ptr.hbm [resolvable:$true] %s793_s17 }
 0x133   : > { %s791_s30 = sshll.u32 %s407_s20, 4  ;;  %s774_s18 = scalar_lea.sflag [#allocation4], %s1735_s1  ;;  %s792_s30 = int_to_ptr.vmem [resolvable:$true] %s791_s30 }
 0x134   : > { %s1468_s11 = sshra.s32 %s794_s17, 4  ;;  %s1474_s4 = scalar_lea.hbm %s1858_s28, 16  ;;  %s1469_s11 = int_to_ptr.hbm [resolvable:$true] %s1468_s11 }
 0x135   : > { %v1275_v24 = vpop.eup %1274  ;;  %s1470_s13 = scalar_lea.hbm %s1469_s11, 8  ;;  %p1475_p3 = scmp.lt.s32.totalorder %s1469_s11, %s1858_s28 }
 0x136   : > { %v770_v25 = vmul.f32 %v1275_v24, %v1273_v23  ;;  %p1471_p10 = scmp.ne.s32.totalorder %s1469_s11, %s1470_s13  ;;  %p1476_p8 = scmp.lt.s32.totalorder %s1474_s4, %s1470_s13 }
 0x138   : > { %771 = vst [vmem:[%s407_s20] sm:$0xff] %v770_v25  ;;  %p1472_p11 = pnand %p1471_p10, %p1647_p0  ;;  %p1477_p13 = por %p1476_p8, %p1475_p3 }
 0x13a   : > { %p1473_p12 = pneg %p1472_p11 }
 0x13c   : > { %p1478_p9 = pnand %p1477_p13, %p1473_p12 }
 0x13e   : > { %1481 = shalt.err (!%p1478_p9)
}
 0x13f   : > { %1196 = dma.vmem_to_hbm [thread:$0]  (%p1647_p0), %s792_s30, 128, %s794_s17, %s774_s18  }
 0x140 PF: > { %s1859_s1 = sld [smem:[#allocation19_spill]]  ;;  %p1861_p2 = scmp.ge.s32.totalorder %s1532_s27, 2 }
 0x142   : > { %p1218_p4 = pnand %p1861_p2, %p1655_p5 }
 0x144   : > { %p1219_p1 = pneg %p1218_p4 }
 0x146   : > { %s819_s24 = sand.u32 1, %s1859_s1  }
 0x147   : > { %s820_s23 = scalar_lea.sflag [#allocation4], %s819_s24 }
 0x148   : > { %1511 = dma.done.wait (%p1219_p1), %s820_s23, 128  }
 0x149   : > { %1513 = vsyncadd (%p1219_p1), %s820_s23, 4294967168  ;;  %s830_s12 = scalar_lea.sflag [#allocation13], %s819_s24 }
 0x14a   : > { %1515 = dma.done.wait (%p1219_p1), %s830_s12, 128  }
 0x14b   : > { %1517 = vsyncadd (%p1219_p1), %s830_s12, 4294967168  ;;  %s1862_s27 = sld [smem:[#allocation21_spill]]  ;;  %s1865_s24 = smov %s1524_s25 }
 0x14c   : > { %s1863_s22 = sld [smem:[#allocation20_spill]] }
 0x14d   : > { %s1864_s26 = sld [smem:[#allocation22_spill]] }
 0x151   : > { %p28_p0 = scmp.ge.s32.totalorder %s1862_s27, 4  }
 0x152   : > { %s1866_s25 = smov %s1863_s22 }
 0x153   :  { %30 = sbr.rel (!%p28_p0) target bundleno = 15 (0xf), region = 138 }
 0x158   :  { %836 = vsyncpa [#allocation3], 1 }
 0x159   :  { %838 = vsyncpa [#allocation3 + $0x1], 1 }
 0x15a   :  { %839 = vsyncpa [#allocation6], 1 }
 0x15b   :  { %841 = vsyncpa [#allocation6 + $0x1], 1 }
 0x15c   :  { %842 = vsyncpa [#allocation9], 1 }
 0x15d   :  { %843 = vsyncpa [#allocation4], 1 }
 0x15e   :  { %845 = vsyncpa [#allocation4 + $0x1], 1 }
 0x15f   :  { %846 = vsyncpa [#allocation13], 1 }
 0x160   :  { %848 = vsyncpa [#allocation13 + $0x1], 1 }

</bundles_post_ra>
